<compile_context>
chip_gen: v6e
topology: v6e:2x2x1
jax: 0.10.0
libtpu: 0.0.40
codegen_flags: <defaults>
</compile_context>

<pallas_src>
import functools

import jax
import jax.numpy as jnp
from jax import lax
from jax.experimental import pallas as pl
from jax.experimental.pallas import tpu as pltpu


# ----------------------------------------------------------------------------
# pltpu.roll direction probe (cached, one tiny compile).  Keeps the kernel
# correct across jax/Mosaic versions regardless of roll sign convention.
# ----------------------------------------------------------------------------
@functools.lru_cache(maxsize=None)
def _roll_follows_numpy_convention() -> bool:
    def probe(x_ref, o_ref):
        o_ref[...] = pltpu.roll(x_ref[...], 1, axis=1)

    x = jnp.broadcast_to(jnp.arange(128, dtype=jnp.float32), (8, 128))
    out = pl.pallas_call(
        probe, out_shape=jax.ShapeDtypeStruct((8, 128), jnp.float32))(x)
    # numpy convention: result[0] == x[-1] == 127
    return bool(jax.device_get(out)[0, 0] == 127.0)


# tap order: ky-major then kx, offsets are (ky-1, kx-1) before dilation scaling
_TAPS = tuple((ky - 1, kx - 1) for ky in range(3) for kx in range(3))


# ----------------------------------------------------------------------------
# Kernel
# ----------------------------------------------------------------------------
def _bottleneck_kernel(x_ref, mask_ref, w1_ref, w2_ref, w3_ref,
                       b1_ref, b2_ref, b3_ref, out_ref, *,
                       W, dilation, roll_like_numpy):
    Pp = w1_ref.shape[0]                    # padded planes (multiple of 8)
    L = x_ref.shape[1]                      # lane width of this strip
    d = dilation

    x = x_ref[...]                          # (Cin, L) f32 -- residual + conv1 in

    # ---- conv1 (1x1) + folded BN + ReLU (bf16 matmul, f32 accumulate) -------
    h1 = jnp.dot(w1_ref[...], x.astype(jnp.bfloat16),
                 preferred_element_type=jnp.float32)
    h1 = jnp.maximum(h1 + b1_ref[...], 0.0)                  # (Pp, L) f32

    # ---- conv2 (3x3, dilation=d, padding=d): per-tap accumulation -----------
    # Each tap reads h1 at (y + ty*d, x + tx*d); in the flat lane layout that
    # is a lane rotation by off = ty*d*W + tx*d.  Out-of-image positions (and
    # wrap-around / cross-image reads) are zeroed by the precomputed (1, L)
    # boundary mask for that tap.  Each masked tap is contracted immediately
    # with its (Pp, Pp) weight plane -- no im2col buffer is materialized.
    acc = None
    for t, (ty, tx) in enumerate(_TAPS):
        off = ty * d * W + tx * d
        if off == 0:
            tap = h1
        else:
            shift = (-off) % L if roll_like_numpy else off % L
            tap = pltpu.roll(h1, shift, axis=1)               # XLU slot
        tap = tap * mask_ref[t]                               # (1, L) f32 bcast
        contrib = jnp.dot(w2_ref[t], tap.astype(jnp.bfloat16),
                          preferred_element_type=jnp.float32)
        acc = contrib if acc is None else acc + contrib
    h2 = jnp.maximum(acc + b2_ref[...], 0.0)                  # (Pp, L) f32

    # ---- conv3 (1x1) + folded BN + residual + ReLU ---------------------------
    h3 = jnp.dot(w3_ref[...], h2.astype(jnp.bfloat16),
                 preferred_element_type=jnp.float32)
    out_ref[...] = jnp.maximum(h3 + b3_ref[...] + x, 0.0).astype(out_ref.dtype)


# ----------------------------------------------------------------------------
# Wrapper helpers: fold BN scales into bf16 weights, pad planes, build masks.
# ----------------------------------------------------------------------------
def _fold_and_pad_params(params, pp):
    w1, w2, w3, s1, b1, s2, b2, s3, b3 = params
    P, Cin = w1.shape[0], w1.shape[1]
    Cout = w3.shape[0]
    pad = pp - P

    # conv1: (P, Cin, 1, 1) -> (Pp, Cin) bf16, BN1 scale folded per out channel.
    w1m = s1[:, None] * w1.reshape(P, Cin)
    w1m = jnp.pad(w1m, ((0, pad), (0, 0))).astype(jnp.bfloat16)

    # conv2: (P, P, 3, 3) -> (9, Pp, Pp) bf16, tap-major planes, BN2 folded.
    w2p = jnp.pad(w2, ((0, pad), (0, pad), (0, 0), (0, 0)))
    s2p = jnp.pad(s2, (0, pad))
    w2s = s2p[:, None, None, None] * w2p                       # (Pp, Pp, 3, 3)
    w2f = jnp.transpose(w2s, (2, 3, 0, 1)).reshape(9, pp, pp).astype(jnp.bfloat16)

    # conv3: (Cout, P, 1, 1) -> (Cout, Pp) bf16, BN3 folded.
    w3m = s3[:, None] * w3.reshape(Cout, P)
    w3m = jnp.pad(w3m, ((0, 0), (0, pad))).astype(jnp.bfloat16)

    b1c = jnp.pad(b1, (0, pad)).reshape(pp, 1).astype(jnp.float32)
    b2c = jnp.pad(b2, (0, pad)).reshape(pp, 1).astype(jnp.float32)
    b3c = b3.reshape(Cout, 1).astype(jnp.float32)
    return w1m, w2f, w3m, b1c, b2c, b3c


def _build_masks(H, W, HW_pad, ipb, dilation):
    """Per-tap zero-padding boundary masks, shape (9, 1, ipb*HW_pad) f32."""
    d = dilation
    q = jnp.arange(HW_pad, dtype=jnp.int32)
    y = q // W
    xx = q % W
    valid = q < H * W                       # per-image tail pad never contributes
    rows = []
    for ty, tx in _TAPS:
        dy, dx = ty * d, tx * d
        m = valid
        if dy > 0:
            m = m & (y < H - dy)
        if dy < 0:
            m = m & (y >= -dy)
        if dx > 0:
            m = m & (xx < W - dx)
        if dx < 0:
            m = m & (xx >= -dx)
        rows.append(m)
    masks = jnp.stack(rows, axis=0).astype(jnp.float32)        # (9, HW_pad)
    masks = jnp.tile(masks, (1, ipb))                          # (9, ipb*HW_pad)
    return masks.reshape(9, 1, ipb * HW_pad)


# ----------------------------------------------------------------------------
# Public wrapper
# ----------------------------------------------------------------------------
def bottleneck_pallas(x_nchw, params, *, dilation, target_lanes=2048):
    """x_nchw: (N, Cin, H, W) float32 (PyTorch layout). Returns (N, Cout, H, W)."""
    N, Cin, H, W = x_nchw.shape
    P = params[0].shape[0]
    Cout = params[2].shape[0]
    assert Cin == Cout == 4 * P, (
        "residual add requires inplanes == 4*planes (stride=1, downsample=None)")
    HW = H * W
    HW_pad = ((HW + 127) // 128) * 128          # per-image tail pad -> lane-dense
    pp = ((P + 7) // 8) * 8                     # pad planes to sublane tile

    # Fold whole images into the lane dimension; grid over lane strips.
    ipb = max(1, min(N, max(1, target_lanes // HW_pad)))   # images per block
    n_blocks = -(-N // ipb)
    N_pad = n_blocks * ipb
    L = ipb * HW_pad

    w1m, w2f, w3m, b1c, b2c, b3c = _fold_and_pad_params(params, pp)
    masks = _build_masks(H, W, HW_pad, ipb, dilation)

    xf = x_nchw.reshape(N, Cin, HW).astype(jnp.float32)
    xf = jnp.pad(xf, ((0, N_pad - N), (0, 0), (0, HW_pad - HW)))
    xf = jnp.transpose(xf, (1, 0, 2)).reshape(Cin, N_pad * HW_pad)

    kernel = functools.partial(
        _bottleneck_kernel, W=W, dilation=dilation,
        roll_like_numpy=_roll_follows_numpy_convention())

    const = lambda shape: pl.BlockSpec(shape, lambda b: (0,) * len(shape))

    out = pl.pallas_call(
        kernel,
        out_shape=jax.ShapeDtypeStruct((Cout, N_pad * HW_pad), jnp.float32),
        grid_spec=pltpu.PrefetchScalarGridSpec(
            num_scalar_prefetch=0,
            grid=(n_blocks,),
            in_specs=[
                pl.BlockSpec((Cin, L), lambda b: (0, b)),   # x (lane strip)
                const((9, 1, L)),        # boundary masks (grid-invariant)
                const((pp, Cin)),        # w1 bf16 (BN1 folded)
                const((9, pp, pp)),      # w2 bf16 tap planes (BN2 folded)
                const((Cout, pp)),       # w3 bf16 (BN3 folded)
                const((pp, 1)),          # bias1
                const((pp, 1)),          # bias2
                const((Cout, 1)),        # bias3
            ],
            out_specs=pl.BlockSpec((Cout, L), lambda b: (0, b)),
        ),
        compiler_params=pltpu.CompilerParams(
            dimension_semantics=("parallel",),          # both TCs on v7x
            vmem_limit_bytes=48 * 1024 * 1024),
    )(xf, masks, w1m, w2f, w3m, b1c, b2c, b3c)

    out = out.reshape(Cout, N_pad, HW_pad)[:, :N, :HW]
    return jnp.transpose(out, (1, 0, 2)).reshape(N, Cout, H, W)


# ----------------------------- reference (pure JAX) --------------------------
def bottleneck_ref(x, params, *, dilation):
    w1, w2, w3, s1, b1, s2, b2, s3, b3 = params
    dn = ("NCHW", "OIHW", "NCHW")
    prec = lax.Precision.HIGHEST
    bn = lambda o, s, b: o * s[None, :, None, None] + b[None, :, None, None]

    out = lax.conv_general_dilated(x, w1, (1, 1), "VALID",
                                   dimension_numbers=dn, precision=prec)
    out = jnp.maximum(bn(out, s1, b1), 0.0)
    out = lax.conv_general_dilated(out, w2, (1, 1),
                                   [(dilation, dilation), (dilation, dilation)],
                                   rhs_dilation=(dilation, dilation),
                                   dimension_numbers=dn, precision=prec)
    out = jnp.maximum(bn(out, s2, b2), 0.0)
    out = lax.conv_general_dilated(out, w3, (1, 1), "VALID",
                                   dimension_numbers=dn, precision=prec)
    out = bn(out, s3, b3)
    return jnp.maximum(out + x, 0.0)


def make_params(key, inplanes, planes, eps=1e-5):
    """Synthetic PyTorch-shaped conv weights + folded (frozen, eval) BN params."""
    out_planes = planes * 4
    ks = jax.random.split(key, 15)

    w1 = jax.random.normal(ks[0], (planes, inplanes, 1, 1), jnp.float32) * 0.1
    w2 = jax.random.normal(ks[1], (planes, planes, 3, 3), jnp.float32) * 0.1
    w3 = jax.random.normal(ks[2], (out_planes, planes, 1, 1), jnp.float32) * 0.1

    def bn(kg, kb, km, kv, c):
        gamma = 1.0 + 0.1 * jax.random.normal(kg, (c,), jnp.float32)
        beta = 0.1 * jax.random.normal(kb, (c,), jnp.float32)
        mean = 0.1 * jax.random.normal(km, (c,), jnp.float32)
        var = 0.5 + jnp.abs(jax.random.normal(kv, (c,), jnp.float32))
        scale = gamma * lax.rsqrt(var + eps)
        bias = beta - mean * scale
        return scale, bias

    s1, b1 = bn(ks[3], ks[4], ks[5], ks[6], planes)
    s2, b2 = bn(ks[7], ks[8], ks[9], ks[10], planes)
    s3, b3 = bn(ks[11], ks[12], ks[13], ks[14], out_planes)
    return (w1, w2, w3, s1, b1, s2, b2, s3, b3)


if __name__ == "__main__":
    N, inplanes, planes, H, W = 2, 16, 4, 16, 16
    dilation = 2

    key = jax.random.PRNGKey(0)
    kx, kp = jax.random.split(key)
    x = jax.random.normal(kx, (N, inplanes, H, W), jnp.float32)   # PyTorch NCHW
    params = make_params(kp, inplanes, planes)

    out = jax.block_until_ready(bottleneck_pallas(x, params, dilation=dilation))
    ref = bottleneck_ref(x, params, dilation=dilation)

    assert out.shape == (N, planes * 4, H, W)
    # bf16 matmul inputs (f32 accumulate) -> looser tolerance vs HIGHEST ref.
    assert jnp.allclose(out, ref, atol=3e-2, rtol=3e-2), "mismatch vs reference"

    print("KERNEL_OK")
</pallas_src>

<mosaic_0001>
module attributes {stable_mosaic.version = 11 : i64} {
  func.func @probe(%arg0: memref<8x128xf32, #tpu.memory_space<vmem>>, %arg1: memref<8x128xf32, #tpu.memory_space<vmem>>) attributes {dimension_semantics = [], scalar_prefetch = 0 : i64, scratch_operands = 0 : i64, tpu.core_type = #tpu.core_type<tc>} {
    %c0 = arith.constant 0 : index
    %c0_0 = arith.constant 0 : index
    %0 = vector.load %arg0[%c0, %c0_0] : memref<8x128xf32, #tpu.memory_space<vmem>>, vector<8x128xf32>
    %c1_i32 = arith.constant 1 : i32
    %1 = tpu.dynamic_rotate %0 by %c1_i32 dim 1 : vector<8x128xf32>, i32 -> vector<8x128xf32>
    %c0_1 = arith.constant 0 : index
    %c0_2 = arith.constant 0 : index
    %2 = vector.load %arg1[%c0_1, %c0_2] : memref<8x128xf32, #tpu.memory_space<vmem>>, vector<8x128xf32>
    tpu.vector_store %arg1[%c0_1, %c0_2], %1 {strides = array<i32>} : memref<8x128xf32, #tpu.memory_space<vmem>>, vector<8x128xf32>,
    return
  }
}

</mosaic_0001>

<bundles_post_ra>
// kernel: tpu_custom_call.1
= control target key start
LH: loop header
LB: loop body
LE: loop exit
PB: predicated region body
PF: predicated region fallthrough
CT: control target
= control target key end

     0   :  { %6 = vsyncpa [#allocation3], 0  ;;  %s106_s0 = inlined_call_operand.hbm [shape: f32[8,128], index: 0, kind: input, shape index: {}]   ;;  %s107_s1 = inlined_call_operand.hbm [shape: f32[8,128], index: 1, kind: output, shape index: {}]  }
   0x1   :  { %7 = vsyncpa [#allocation4], 0  ;;  %s87_s6 = smov [#allocation2]  }
   0x2   :  { %s14_s7 = sshll.u32 %s87_s6, 4  ;;  %s15_s7 = int_to_ptr.vmem [resolvable:$true] %s14_s7 }
   0x3   :  { %s51_s8 = scalar_lea.vmem %s15_s7, 128  ;;  %p56_p1 = scmp.lt.s32.totalorder %s15_s7, %s15_s7 }
   0x4   :  { %p52_p0 = scmp.ne.s32.totalorder %s15_s7, %s51_s8  ;;  %p57_p2 = scmp.lt.s32.totalorder %s51_s8, %s51_s8 }
   0x6   :  { %p58_p3 = por %p57_p2, %p56_p1 }
   0x8   :  { %p59_p4 = pnand %p58_p3, %p52_p0 }
   0xa   :  { %62 = shalt.err (!%p59_p4)
}
   0xb   :  { %17 = dma.hbm_to_vmem [thread:$0]  %s106_s0, 128, %s15_s7, [#allocation3]  }
   0xc   :  { %83 = dma.done.wait [#allocation3], 128  }
   0xd   :  { %84 = vsyncadd [#allocation3], 4294967168  ;;  %v21_v0 = vld [vmem:[#allocation2] sm:$0xff]  ;;  %s88_s11 = smov 1   ;;  %s89_s12 = smov [#allocation5]  }
   0xe   :  { %22 = vrot.lane.b32.xlu0 %v21_v0, %s88_s11  ;;  %s31_s13 = sshll.u32 %s89_s12, 4  ;;  %s32_s13 = int_to_ptr.vmem [resolvable:$true] %s31_s13 }
   0xf   :  { %s63_s14 = scalar_lea.vmem %s32_s13, 128  ;;  %p68_p6 = scmp.lt.s32.totalorder %s32_s13, %s32_s13 }
  0x10   :  { %p64_p5 = scmp.ne.s32.totalorder %s32_s13, %s63_s14  ;;  %p69_p7 = scmp.lt.s32.totalorder %s63_s14, %s63_s14 }
  0x12   :  { %p70_p8 = por %p69_p7, %p68_p6 }
  0x14   :  { %p71_p9 = pnand %p70_p8, %p64_p5 }
  0x80   :  { %v23_v1 = vpop.permute.xlu0 %22 }
  0x81   :  { %24 = vst [vmem:[#allocation5] sm:$0xff] %v23_v1 }
  0x82   :  { %74 = shalt.err (!%p71_p9)
}
  0x83   :  { %34 = dma.vmem_to_hbm [thread:$0]  %s32_s13, 128, %s107_s1, [#allocation4]  }
  0x84   :  { %85 = dma.done.wait [#allocation4], 128  }
  0x85   :  { %86 = vsyncadd [#allocation4], 4294967168 }
  0x86   :  { %38 = vsyncpa [#allocation3], 1 }
  0x87   :  { %39 = vsyncpa [#allocation4], 1 }

</bundles_post_ra>
